<compile_context>
chip_gen: v7x
topology: tpu7x:2x2x1
jax: 0.10.0
libtpu: 0.0.40
codegen_flags: <defaults>
</compile_context>

<pallas_src>
import jax
import jax.numpy as jnp
from jax import lax
from jax.experimental import pallas as pl
from jax.experimental.pallas import tpu as pltpu


# --------------------------- VMEM budgeting ---------------------------------

def _vmem_capacity_bytes():
    """Physical VMEM per TensorCore; conservative 64 MiB (v7x) fallback."""
    try:
        info = pltpu.get_tpu_info()
        cap = getattr(info, "vmem_capacity_bytes", None)
        if cap:
            return int(cap)
    except Exception:
        pass
    return 64 * 1024 * 1024


def _choose_tile_r(rows, hw, itemsize, vmem_cap, max_tile_bytes=None):
    """Largest sublane-packed row tile that fits the per-generation VMEM budget.

    Budget model: 2 inputs x 2 pipeline buffers in the native dtype, plus ~6
    full-tile f32 temporaries that Mosaic materialises for the elementwise math,
    inside ~70% of physical VMEM (accumulator + outputs are negligible).
    """
    packing = max(8, 32 // max(1, itemsize))   # 8 f32 / 16 bf16 / 32 int8|fp8
    if rows < packing:
        return int(rows)
    row_native = hw * itemsize
    row_f32 = hw * 4
    budget = int(0.70 * vmem_cap) - (4 << 20)
    per_row = 4 * row_native + 6 * row_f32
    t = max(packing, budget // max(1, per_row))
    cap_bytes = (8 << 20) if max_tile_bytes is None else int(max_tile_bytes)
    t = min(t, max(1, cap_bytes // max(1, row_native)))   # cap per-input tile
    t = min(t, rows)
    t = max(packing, (t // packing) * packing)
    return int(t)


# --------------------------- negative loss -----------------------------------

def _make_neg_kernel(rows, tile_r, fold_rows, mask_rows):
    folds = tile_r // fold_rows

    def kernel(out_ref, tgt_ref, part_ref, acc_ref):
        q = pl.program_id(1)

        @pl.when(q == 0)
        def _():
            acc_ref[...] = jnp.zeros_like(acc_ref)

        p = out_ref[...].astype(jnp.float32)
        g = tgt_ref[...].astype(jnp.float32)
        t = 1.0 - g
        t2 = t * t                                      # (1-g)^4 via two squarings
        contrib = jnp.log(1.0 - p) * (p * p) * (t2 * t2)

        if mask_rows:
            # Zero rows past the end of the array; also kills fully-phantom
            # blocks introduced by the forced 2-way megacore split.
            blk = pl.program_id(0) * pl.num_programs(1) + q
            ridx = blk * tile_r + lax.broadcasted_iota(jnp.int32, (tile_r, 1), 0)
            contrib = jnp.where(ridx < rows, contrib, 0.0)

        if folds > 1:
            # Layout-preserving fold to (fold_rows, HW): regroups whole sublane
            # tiles, so this is pure cross-vreg VPU adds (no XLU reduce here).
            hw = contrib.shape[1]
            contrib = contrib.reshape(folds, fold_rows, hw).sum(axis=0)
        acc_ref[...] += contrib

        @pl.when(q == pl.num_programs(1) - 1)
        def _():
            part_ref[...] = jnp.sum(acc_ref[...]).reshape(1, 1, 1)

    return kernel


# ------------------------------ wrapper ---------------------------------------

def fast_focal_loss(out, target, ind, mask, cat, _max_tile_bytes=None):
    """Matches FastFocalLoss.forward(out, target, ind, mask, cat)."""
    B, C, H, W = out.shape
    HW = H * W
    rows = B * C

    # ---------- negative loss: dense streaming reduction over B*C*H*W ---------
    out2d = out.reshape(rows, HW)        # free reshape, native dtype (bf16 stays bf16)
    tgt2d = target.reshape(rows, HW)

    vmem_cap = _vmem_capacity_bytes()
    itemsize = out2d.dtype.itemsize
    tile_r = _choose_tile_r(rows, HW, itemsize, vmem_cap, _max_tile_bytes)
    num_blocks = -(-rows // tile_r)
    n_par = 2 if num_blocks >= 2 else 1                  # always split when possible
    q_steps = -(-num_blocks // n_par)
    mask_rows = (n_par * q_steps * tile_r) != rows       # partial and/or phantom blocks
    fold_rows = 8 if (tile_r % 8 == 0) else tile_r

    last_blk = num_blocks - 1

    def in_map(i, j):
        # Clamp so phantom blocks (odd block count split over 2 cores) DMA the
        # last valid block; their contribution is zeroed by the in-kernel mask.
        return (jnp.minimum(i * q_steps + j, last_blk), 0)

    tile_in_bytes = tile_r * HW * itemsize
    tile_f32_bytes = tile_r * HW * 4
    needed = 4 * tile_in_bytes + 6 * tile_f32_bytes + fold_rows * HW * 4 + (4 << 20)
    vmem_limit = int(max(16 << 20, min(int(0.9 * vmem_cap), needed)))

    partials = pl.pallas_call(
        _make_neg_kernel(rows, tile_r, fold_rows, mask_rows),
        out_shape=jax.ShapeDtypeStruct((n_par, 1, 1), jnp.float32),
        grid=(n_par, q_steps),
        in_specs=[
            pl.BlockSpec((tile_r, HW), in_map),
            pl.BlockSpec((tile_r, HW), in_map),
        ],
        out_specs=pl.BlockSpec((1, 1, 1), lambda i, j: (i, 0, 0)),
        scratch_shapes=[pltpu.VMEM((fold_rows, HW), jnp.float32)],
        compiler_params=pltpu.CompilerParams(
            dimension_semantics=("parallel", "arbitrary"),
            vmem_limit_bytes=vmem_limit,
        ),
    )(out2d, tgt2d)
    neg_sum = jnp.sum(partials)

    # ---------- positive loss: sparse B*M-element gather (plain JAX) ----------
    # Per perf review: the gather touches only B*M elements, so a per-peak Pallas
    # grid is pure step/DMA overhead — a flat-index take_along_axis is free
    # relative to the dense negative pass.
    flat_idx = jnp.asarray(cat, jnp.int32) * HW + jnp.asarray(ind, jnp.int32)   # (B, M)
    pp = jnp.take_along_axis(out.reshape(B, C * HW), flat_idx, axis=1)
    pp = pp.astype(jnp.float32)
    maskf = jnp.asarray(mask, jnp.float32)
    num_pos = jnp.sum(maskf)
    pos_term = jnp.where(maskf > 0, jnp.log(pp) * jnp.square(1.0 - pp) * maskf, 0.0)
    pos_sum = jnp.sum(pos_term)

    denom = jnp.where(num_pos == 0, jnp.float32(1.0), num_pos)
    return jnp.where(num_pos == 0, -neg_sum, -(pos_sum + neg_sum) / denom)


# ------------------------------ reference -------------------------------------

def _reference(out, target, ind, mask, cat):
    """Pure-JAX reference mirroring the PyTorch forward."""
    B, C, H, W = out.shape
    neg = jnp.sum(jnp.log(1.0 - out) * out**2 * (1.0 - target) ** 4)
    feat = jnp.transpose(out.reshape(B, C, H * W), (0, 2, 1))          # (B, HW, C)
    ppix = jnp.take_along_axis(feat, ind[:, :, None], axis=1)          # (B, M, C)
    pp = jnp.take_along_axis(ppix, cat[:, :, None], axis=2)[..., 0]    # (B, M)
    num_pos = mask.sum()
    pos = jnp.sum(jnp.log(pp) * (1.0 - pp) ** 2 * mask)
    denom = jnp.where(num_pos == 0, 1.0, num_pos)
    return jnp.where(num_pos == 0, -neg, -(pos + neg) / denom)


if __name__ == "__main__":
    H, W = 16, 16
    key = jax.random.PRNGKey(0)
    k1, k2, k3, k4, k5, j1, j2, j3, j4, j5 = jax.random.split(key, 10)

    # ---- config 1: module-sized small shapes -------------------------------
    B, C, M = 2, 4, 8
    out = jax.nn.sigmoid(jax.random.normal(k1, (B, C, H, W), jnp.float32))
    out = jnp.clip(out, 1e-4, 1.0 - 1e-4)
    target = jax.random.uniform(k2, (B, C, H, W), jnp.float32, 0.0, 0.9)
    ind = jax.random.randint(k3, (B, M), 0, H * W, dtype=jnp.int32)
    cat = jax.random.randint(k4, (B, M), 0, C, dtype=jnp.int32)
    mask = (jax.random.uniform(k5, (B, M)) > 0.3).astype(jnp.float32)

    loss = jax.block_until_ready(jax.jit(fast_focal_loss)(out, target, ind, mask, cat))
    expected = _reference(out, target, ind, mask, cat)
    assert jnp.allclose(loss, expected, rtol=1e-3, atol=1e-3), (loss, expected)

    # ---- config 2: force multi-block / odd block count / megacore + phantom-
    # block clamp path and the partial-last-block mask, at small size ---------
    B2, C2, M2 = 2, 20, 8
    out2 = jnp.clip(jax.nn.sigmoid(jax.random.normal(j1, (B2, C2, H, W), jnp.float32)),
                    1e-4, 1.0 - 1e-4)
    target2 = jax.random.uniform(j2, (B2, C2, H, W), jnp.float32, 0.0, 0.9)
    ind2 = jax.random.randint(j3, (B2, M2), 0, H * W, dtype=jnp.int32)
    cat2 = jax.random.randint(j4, (B2, M2), 0, C2, dtype=jnp.int32)
    mask2 = (jax.random.uniform(j5, (B2, M2)) > 0.3).astype(jnp.float32)

    small_tile_fn = jax.jit(
        lambda o, t, i, m, c: fast_focal_loss(o, t, i, m, c, _max_tile_bytes=16 * 1024))
    loss2 = jax.block_until_ready(small_tile_fn(out2, target2, ind2, mask2, cat2))
    expected2 = _reference(out2, target2, ind2, mask2, cat2)
    assert jnp.allclose(loss2, expected2, rtol=1e-3, atol=1e-3), (loss2, expected2)

    print("KERNEL_OK")
</pallas_src>

<mosaic_0001>
module attributes {stable_mosaic.version = 11 : i64} {
  func.func @kernel(%arg0: i32, %arg1: i32, %arg2: memref<8x256xf32, #tpu.memory_space<vmem>>, %arg3: memref<8x256xf32, #tpu.memory_space<vmem>>, %arg4: memref<1x1x1xf32, #tpu.memory_space<vmem>>, %arg5: memref<8x256xf32, #tpu.memory_space<vmem>>) attributes {dimension_semantics = [#tpu.dimension_semantics<parallel>, #tpu.dimension_semantics<arbitrary>], iteration_bounds = array<i64: 1, 1>, scalar_prefetch = 0 : i64, scratch_operands = 1 : i64, tpu.core_type = #tpu.core_type<tc>, window_params = [{transform_indices = @transform_0, window_bounds = array<i64: 8, 256>}, {transform_indices = @transform_1, window_bounds = array<i64: 8, 256>}, {transform_indices = @transform_2, window_bounds = array<i64: 1, 1, 1>}]} {
    %c0_i32 = arith.constant 0 : i32
    %0 = arith.cmpi eq, %arg1, %c0_i32 : i32
    %1 = arith.extui %0 : i1 to i32
    %c0_i32_0 = arith.constant 0 : i32
    %2 = arith.cmpi ne, %1, %c0_i32_0 : i32
    scf.if %2 {
      %cst_11 = arith.constant 0.000000e+00 : f32
      %21 = vector.broadcast %cst_11 : f32 to vector<8x256xf32>
      %c0_12 = arith.constant 0 : index
      %c0_13 = arith.constant 0 : index
      %22 = vector.load %arg5[%c0_12, %c0_13] : memref<8x256xf32, #tpu.memory_space<vmem>>, vector<8x256xf32>
      tpu.vector_store %arg5[%c0_12, %c0_13], %21 {strides = array<i32>} : memref<8x256xf32, #tpu.memory_space<vmem>>, vector<8x256xf32>,
    } else {
    }
    %c0 = arith.constant 0 : index
    %c0_1 = arith.constant 0 : index
    %3 = vector.load %arg2[%c0, %c0_1] : memref<8x256xf32, #tpu.memory_space<vmem>>, vector<8x256xf32>
    %c0_2 = arith.constant 0 : index
    %c0_3 = arith.constant 0 : index
    %4 = vector.load %arg3[%c0_2, %c0_3] : memref<8x256xf32, #tpu.memory_space<vmem>>, vector<8x256xf32>
    %cst = arith.constant 1.000000e+00 : f32
    %5 = vector.broadcast %cst : f32 to vector<8x256xf32>
    %6 = arith.subf %5, %4 : vector<8x256xf32>
    %7 = arith.mulf %6, %6 : vector<8x256xf32>
    %cst_4 = arith.constant 1.000000e+00 : f32
    %8 = vector.broadcast %cst_4 : f32 to vector<8x256xf32>
    %9 = arith.subf %8, %3 : vector<8x256xf32>
    %10 = math.log %9 : vector<8x256xf32>
    %11 = arith.mulf %3, %3 : vector<8x256xf32>
    %12 = arith.mulf %10, %11 : vector<8x256xf32>
    %13 = arith.mulf %7, %7 : vector<8x256xf32>
    %14 = arith.mulf %12, %13 : vector<8x256xf32>
    %c0_5 = arith.constant 0 : index
    %c0_6 = arith.constant 0 : index
    %15 = vector.load %arg5[%c0_5, %c0_6] : memref<8x256xf32, #tpu.memory_space<vmem>>, vector<8x256xf32>
    %16 = arith.addf %15, %14 : vector<8x256xf32>
    %c0_7 = arith.constant 0 : index
    %c0_8 = arith.constant 0 : index
    %17 = vector.load %arg5[%c0_7, %c0_8] : memref<8x256xf32, #tpu.memory_space<vmem>>, vector<8x256xf32>
    tpu.vector_store %arg5[%c0_7, %c0_8], %16 {strides = array<i32>} : memref<8x256xf32, #tpu.memory_space<vmem>>, vector<8x256xf32>,
    %c0_i32_9 = arith.constant 0 : i32
    %18 = arith.cmpi eq, %arg1, %c0_i32_9 : i32
    %19 = arith.extui %18 : i1 to i32
    %c0_i32_10 = arith.constant 0 : i32
    %20 = arith.cmpi ne, %19, %c0_i32_10 : i32
    scf.if %20 {
      %c0_11 = arith.constant 0 : index
      %c0_12 = arith.constant 0 : index
      %21 = vector.load %arg5[%c0_11, %c0_12] : memref<8x256xf32, #tpu.memory_space<vmem>>, vector<8x256xf32>
      %22 = vector.shape_cast %21 : vector<8x256xf32> to vector<1x8x256xf32>
      %cst_13 = arith.constant dense<0.000000e+00> : vector<1xf32>
      %23 = vector.multi_reduction <add>, %22, %cst_13 [1, 2] : vector<1x8x256xf32> to vector<1xf32>
      %24 = vector.shape_cast %23 : vector<1xf32> to vector<1x1x1xf32>
      %25 = vector.extract %24[0, 0, 0] : f32 from vector<1x1x1xf32>
      %26 = vector.broadcast %25 : f32 to vector<1x1x1xf32>
      %c0_14 = arith.constant 0 : index
      %c0_15 = arith.constant 0 : index
      %c0_16 = arith.constant 0 : index
      %27 = vector.load %arg4[%c0_14, %c0_15, %c0_16] : memref<1x1x1xf32, #tpu.memory_space<vmem>>, vector<1x1x1xf32>
      tpu.vector_store %arg4[%c0_14, %c0_15, %c0_16], %26 {strides = array<i32>} : memref<1x1x1xf32, #tpu.memory_space<vmem>>, vector<1x1x1xf32>,
    } else {
    }
    return
  }
  func.func @transform_0(%arg0: i32, %arg1: i32) -> (i32, i32) {
    %c1_i32 = arith.constant 1 : i32
    %0 = arith.muli %arg0, %c1_i32 : i32
    %1 = arith.addi %0, %arg1 : i32
    %c0_i32 = arith.constant 0 : i32
    %2 = arith.minsi %1, %c0_i32 : i32
    %c0_i32_0 = arith.constant 0 : i32
    %c0_i32_1 = arith.constant 0 : i32
    return %2, %c0_i32_0 : i32, i32
  }
  func.func @transform_1(%arg0: i32, %arg1: i32) -> (i32, i32) {
    %c1_i32 = arith.constant 1 : i32
    %0 = arith.muli %arg0, %c1_i32 : i32
    %1 = arith.addi %0, %arg1 : i32
    %c0_i32 = arith.constant 0 : i32
    %2 = arith.minsi %1, %c0_i32 : i32
    %c0_i32_0 = arith.constant 0 : i32
    %c0_i32_1 = arith.constant 0 : i32
    return %2, %c0_i32_0 : i32, i32
  }
  func.func @transform_2(%arg0: i32, %arg1: i32) -> (i32, i32, i32) {
    %c0_i32 = arith.constant 0 : i32
    %c0_i32_0 = arith.constant 0 : i32
    %c0_i32_1 = arith.constant 0 : i32
    return %arg0, %c0_i32, %c0_i32_0 : i32, i32, i32
  }
}

</mosaic_0001>

<bundles_post_ra>
// kernel: fast_focal_loss.1
= control target key start
LH: loop header
LB: loop body
LE: loop exit
PB: predicated region body
PF: predicated region fallthrough
CT: control target
= control target key end

     0   :  { %s221_s0 = inlined_call_operand.vmem [shape: f32[8,256], index: 0, kind: input, shape index: {}]   ;;  %s222_s1 = inlined_call_operand.vmem [shape: f32[8,256], index: 1, kind: input, shape index: {}]   ;;  %s223_s2 = inlined_call_operand.hbm [shape: f32[1,1,1], index: 2, kind: output, shape index: {}]  }
   0x1   :  { %v78_v0 = vld [vmem:[%s221_s0] sm:$0xff]  ;;  %v79_v1 = vld [vmem:[%s221_s0 + $0x8] sm:$0xff] }
   0x2   :  { %v86_v2 = vsub.f32 1.0, %v78_v0  ;;  %v87_v3 = vsub.f32 1.0, %v79_v1 }
   0x3   :  { %7 = vsyncpa [#allocation4], 0  ;;  %v80_v4 = vld [vmem:[%s222_s1] sm:$0xff]  ;;  %v81_v5 = vld [vmem:[%s222_s1 + $0x8] sm:$0xff]  ;;  %v92_v10 = vmul.f32 %v78_v0, %v78_v0  ;;  %v93_v12 = vmul.f32 %v79_v1, %v79_v1  ;;  %s181_s0 = smov [#allocation3]   ;;  %vm122_vm0 = vcmask 0  }
   0x4   :  { %153 = vlog2.f32 %v86_v2  ;;  %v82_v6 = vsub.f32 1.0, %v80_v4  ;;  %v83_v7 = vsub.f32 1.0, %v81_v5  ;;  %s130_s1 = sshll.u32 %s181_s0, 4  ;;  %s131_s1 = int_to_ptr.vmem [resolvable:$true] %s130_s1 }
   0x5   :  { %155 = vlog2.f32 %v87_v3  ;;  %s157_s18 = scalar_lea.vmem %s131_s1, 16  ;;  %s161_s19 = scalar_lea.vmem %s131_s1, 32 }
   0x6   :  { %v84_v8 = vmul.f32 %v82_v6, %v82_v6  ;;  %v85_v9 = vmul.f32 %v83_v7, %v83_v7  ;;  %p158_p0 = scmp.ne.s32.totalorder %s131_s1, %s157_s18  ;;  %p162_p1 = scmp.lt.s32.totalorder %s131_s1, %s131_s1 }
   0x7   :  { %p163_p2 = scmp.lt.s32.totalorder %s161_s19, %s157_s18 }
   0x8   :  { %v96_v15 = vmul.f32 %v84_v8, %v84_v8  ;;  %v97_v17 = vmul.f32 %v85_v9, %v85_v9 }
   0x9   :  { %p164_p3 = por %p163_p2, %p162_p1 }
   0xb   :  { %p165_p4 = pnand %p164_p3, %p158_p0 }
   0xe   :  { %v154_v11 = vpop.eup %153 }
   0xf   :  { %v156_v13 = vpop.eup %155  ;;  %v89_v14 = vmul.f32 0.6931472, %v154_v11 }
  0x10   :  { %v91_v16 = vmul.f32 0.6931472, %v156_v13 }
  0x11   :  { %v94_v18 = vmul.f32 %v92_v10, %v89_v14 }
  0x12   :  { %v95_v19 = vmul.f32 %v93_v12, %v91_v16 }
  0x13   :  { %v98_v20 = vmul.f32 %v96_v15, %v94_v18 }
  0x14   :  { %v99_v21 = vmul.f32 %v97_v17, %v95_v19 }
  0x16   :  { %v111_v22 = vadd.f32 %v99_v21, %v98_v20 }
  0x18   :  { %112 = vadd.xlane.f32.xlu0 %v111_v22 }
  0xa5   :  { %v113_v23 = vpop.xlane.xlu0 %112 }
  0xa6   :  { %v114_v24 = vrot.slane %v113_v23, 4 }
  0xa8   :  { %v115_v25 = vadd.f32 %v114_v24, %v113_v23 }
  0xaa   :  { %v116_v26 = vrot.slane %v115_v25, 2 }
  0xac   :  { %v117_v27 = vadd.f32 %v116_v26, %v115_v25 }
  0xae   :  { %v118_v28 = vrot.slane %v117_v27, 1 }
  0xb0   :  { %v119_v29 = vadd.f32 %v118_v28, %v117_v27 }
  0xb2   :  { %150 = vpush %v119_v29 }
  0xe3   :  { %s151_s17 = spop %150 }
  0xe4   :  { %v121_v30 = vstv %s151_s17 }
  0xe5   :  { %123 = vst.msk [vmem:[#allocation3] sm:$0x1] %vm122_vm0, %v121_v30 }
  0xe6   :  { %168 = shalt.err (!%p165_p4)
}
  0xe7   :  { %s169_s22 = scalar_lea.hbm %s223_s2, 16 }
  0xe8   :  { %p170_p5 = scmp.ne.s32.totalorder %s223_s2, %s169_s22  ;;  %p173_p6 = scmp.lt.u32.totalorder %s169_s22, %s223_s2 }
  0xea   :  { %p175_p7 = pnand %p173_p6, %p170_p5 }
  0xec   :  { %178 = shalt.err (!%p175_p7)
}
  0xed   :  { %133 = dma.vmem_to_hbm [thread:$0]  %s131_s1, 16, %s223_s2, [#allocation4]  }
  0xee   :  { %179 = dma.done.wait [#allocation4], 16  }
  0xef   :  { %180 = vsyncadd [#allocation4], 4294967280 }
  0xf0   :  { %137 = vsyncpa [#allocation4], 1 }

</bundles_post_ra>
